<compile_context>
chip_gen: v6e
topology: v6e:2x2x1
jax: 0.10.0
libtpu: 0.0.40
codegen_flags: <defaults>
</compile_context>

<pallas_src>
import math
from functools import partial

import jax
import jax.numpy as jnp
from jax.experimental import pallas as pl
from jax.experimental.pallas import tpu as pltpu


def _layernorm(v, w, b, eps=1e-5):
    mu = jnp.mean(v, axis=-1, keepdims=True)
    var = jnp.mean((v - mu) ** 2, axis=-1, keepdims=True)
    return (v - mu) * jax.lax.rsqrt(var + eps) * w + b


def _gelu_exact(x):
    # nn.GELU() default = exact erf-based GELU
    return 0.5 * x * (1.0 + jax.lax.erf(x / math.sqrt(2.0)))


# ---------------------------------------------------------------------------
# Pass 1: LN1(y) + fused K/V projection, computed once per token.
# ---------------------------------------------------------------------------
def kv_proj_kernel(y_ref, ln1_w_ref, ln1_b_ref, wkv_ref, bkv_ref, k_ref, v_ref):
    y = y_ref[...].astype(jnp.float32)                        # (T, D)
    lny = _layernorm(y, ln1_w_ref[...], ln1_b_ref[...])
    kv = jnp.dot(lny.astype(wkv_ref.dtype), wkv_ref[...],
                 preferred_element_type=jnp.float32) + bkv_ref[...]
    D = y.shape[-1]
    k_ref[...] = kv[:, :D].astype(k_ref.dtype)
    v_ref[...] = kv[:, D:].astype(v_ref.dtype)


# ---------------------------------------------------------------------------
# Pass 2: flash-style attention + fc + residual + LN2 + exact-GELU MLP.
# Grid = (B, n_q_tiles, n_kv_tiles), kv axis innermost & "arbitrary".
# ---------------------------------------------------------------------------
def flash_block_kernel(x_ref, k_ref, v_ref,
                       ln1_w_ref, ln1_b_ref, wq_ref, bq_ref,
                       fc_w_ref, fc_b_ref, ln2_w_ref, ln2_b_ref,
                       w1_ref, b1_ref, w2_ref, b2_ref,
                       o_ref,
                       q_scr, m_scr, l_scr, acc_scr,
                       *, n_head, approx_recip):
    kvi = pl.program_id(2)
    n_kv = pl.num_programs(2)
    cdt = wq_ref.dtype                     # MXU operand dtype (bf16 or f32)
    TL, D = x_ref.shape
    TKV = k_ref.shape[0]
    dk = D // n_head

    # --- once per query tile: LN1(x_q), Q projection (1/sqrt(dk) pre-folded) ---
    @pl.when(kvi == 0)
    def _():
        xq = x_ref[...].astype(jnp.float32)
        lnq = _layernorm(xq, ln1_w_ref[...], ln1_b_ref[...])
        q = jnp.dot(lnq.astype(cdt), wq_ref[...],
                    preferred_element_type=jnp.float32) + bq_ref[...]
        q_scr[...] = jnp.transpose(q.reshape(TL, n_head, dk), (1, 0, 2)).astype(cdt)
        m_scr[...] = jnp.full(m_scr.shape, -jnp.inf, dtype=m_scr.dtype)
        l_scr[...] = jnp.zeros(l_scr.shape, dtype=l_scr.dtype)
        acc_scr[...] = jnp.zeros(acc_scr.shape, dtype=acc_scr.dtype)

    # --- online-softmax step over this KV tile: intermediates bounded to (H,TL,TKV) ---
    # TODO(synk): 'causal' / 'doublecausal' mask branches of Block.forward not implemented.
    k3 = jnp.transpose(k_ref[...].reshape(TKV, n_head, dk), (1, 0, 2))     # (H, TKV, dk)
    v3 = jnp.transpose(v_ref[...].reshape(TKV, n_head, dk), (1, 0, 2))     # (H, TKV, dk)
    s = jnp.einsum("hqd,hkd->hqk", q_scr[...], k3,
                   preferred_element_type=jnp.float32)                     # (H, TL, TKV) f32
    m_new = jnp.maximum(m_scr[...], jnp.max(s, axis=-1, keepdims=True))
    alpha = jnp.exp(m_scr[...] - m_new)
    p = jnp.exp(s - m_new)
    l_scr[...] = alpha * l_scr[...] + jnp.sum(p, axis=-1, keepdims=True)
    acc_scr[...] = alpha * acc_scr[...] + jnp.einsum(
        "hqk,hkd->hqd", p.astype(cdt), v3, preferred_element_type=jnp.float32)
    m_scr[...] = m_new

    # --- last KV step: normalize, output projection, residuals, LN2, MLP ---
    @pl.when(kvi == n_kv - 1)
    def _():
        o3 = acc_scr[...] * pl.reciprocal(l_scr[...], approx=approx_recip)  # (H, TL, dk)
        attn_cat = jnp.transpose(o3, (1, 0, 2)).reshape(TL, D)
        attn_out = jnp.dot(attn_cat.astype(cdt), fc_w_ref[...],
                           preferred_element_type=jnp.float32) + fc_b_ref[...]
        x1 = x_ref[...].astype(jnp.float32) + attn_out          # dropout = identity (eval)

        # TODO(synk): for D >= ~2048 on v7x, additionally tile the 4D MLP hidden dim
        # (extra grid axis / emit_pipeline over w1/w2 K-chunks) instead of VMEM-resident.
        ln2x = _layernorm(x1, ln2_w_ref[...], ln2_b_ref[...])
        h1 = jnp.dot(ln2x.astype(cdt), w1_ref[...],
                     preferred_element_type=jnp.float32) + b1_ref[...]
        g = _gelu_exact(h1)
        h2 = jnp.dot(g.astype(cdt), w2_ref[...],
                     preferred_element_type=jnp.float32) + b2_ref[...]
        o_ref[...] = (x1 + h2).astype(o_ref.dtype)


# ---------------------------------------------------------------------------
# Helpers
# ---------------------------------------------------------------------------
def _pick_tile(L, target):
    """Largest tile <= target dividing L; prefer MXU-friendly multiples (256, 128)."""
    if L <= target:
        return L
    for step in (256, 128, 8):
        t = (min(target, L) // step) * step
        while t >= step:
            if L % t == 0:
                return t
            t -= step
    # TODO(synk): pad ragged L (and mask the tail) instead of falling back to full L.
    return L


def _clamp_vmem(nbytes):
    """Clamp requested scoped VMEM to [32 MiB, 0.85 * physical VMEM]."""
    try:
        phys = int(pltpu.get_tpu_info().vmem_capacity_bytes)
    except Exception:
        phys = 64 * 1024 * 1024          # conservative (v7x-sized) fallback
    cap = int(0.85 * phys)               # headroom for Mosaic internal scratch / semaphores
    floor = min(32 * 1024 * 1024, cap)
    return int(max(floor, min(int(nbytes), cap)))


def _const_specs(param_list, n_grid_axes, buffer_count=None):
    """BlockSpecs for weights/biases whose block index never changes."""
    specs = []
    for p in param_list:
        if n_grid_axes == 2:
            idx = lambda b, i, nd=p.ndim: (0,) * nd
        else:
            idx = lambda b, i, j, nd=p.ndim: (0,) * nd
        kwargs = {}
        if buffer_count is not None:
            kwargs["pipeline_mode"] = pl.Buffered(buffer_count)
        specs.append(pl.BlockSpec(p.shape, idx, **kwargs))
    return specs


def _project_kv(x, ln1_w, ln1_b, wkv, bkv, kv_dtype, tile):
    B, L, D = x.shape
    n_t = L // tile
    kv_params = [ln1_w, ln1_b, wkv, bkv]
    nbytes = 2 * sum(p.size * p.dtype.itemsize for p in kv_params)
    nbytes += 2 * (tile * D * 4 + 2 * tile * D * jnp.dtype(kv_dtype).itemsize)
    nbytes += 4 * (3 * tile * 2 * D)      # in-kernel f32 intermediates
    vmem = _clamp_vmem(int(nbytes * 1.5))
    return pl.pallas_call(
        kv_proj_kernel,
        out_shape=(jax.ShapeDtypeStruct((B, L, D), kv_dtype),
                   jax.ShapeDtypeStruct((B, L, D), kv_dtype)),
        grid_spec=pltpu.PrefetchScalarGridSpec(
            num_scalar_prefetch=0,
            grid=(B, n_t),
            in_specs=[pl.BlockSpec((None, tile, D), lambda b, i: (b, i, 0))]
                     + _const_specs(kv_params, 2),
            out_specs=[pl.BlockSpec((None, tile, D), lambda b, i: (b, i, 0)),
                       pl.BlockSpec((None, tile, D), lambda b, i: (b, i, 0))]),
        compiler_params=pltpu.CompilerParams(
            dimension_semantics=("parallel", "parallel"),
            vmem_limit_bytes=vmem),
    )(x, *kv_params)


def block_forward(x, params, n_head, *, compute_dtype=jnp.bfloat16,
                  seq_tile=256, kv_tile=512, approx_recip=True):
    B, L, D = x.shape
    cd = compute_dtype
    cd_sz = jnp.dtype(cd).itemsize
    dk = D // n_head
    scale = 1.0 / math.sqrt(dk)

    TL = _pick_tile(L, seq_tile)
    TKV = _pick_tile(L, kv_tile)
    n_q, n_kv = L // TL, L // TKV

    # Fold 1/sqrt(dk) into the query projection (removes an in-kernel VALU multiply).
    wq = (params["wq"] * scale).astype(cd)
    bq = params["bq"] * scale
    # Fused K/V projection weights (K/V computed once per token by the first pass).
    wkv = jnp.concatenate([params["wk"], params["wv"]], axis=1).astype(cd)
    bkv = jnp.concatenate([params["bk"], params["bv"]], axis=1)

    # Pass 1: K/V in compute dtype (bf16 on the perf path -> half the HBM/VMEM traffic).
    k, v = _project_kv(x, params["ln1_w"], params["ln1_b"], wkv, bkv, cd, TKV)

    main_params = [
        params["ln1_w"], params["ln1_b"],
        wq, bq,
        params["fc_w"].astype(cd), params["fc_b"],
        params["ln2_w"], params["ln2_b"],
        params["w1"].astype(cd), params["b1"],
        params["w2"].astype(cd), params["b2"],
    ]

    x_spec = pl.BlockSpec((None, TL, D), lambda b, qi, kvi: (b, qi, 0))
    k_spec = pl.BlockSpec((None, TKV, D), lambda b, qi, kvi: (b, kvi, 0))
    v_spec = pl.BlockSpec((None, TKV, D), lambda b, qi, kvi: (b, kvi, 0))
    out_spec = pl.BlockSpec((None, TL, D), lambda b, qi, kvi: (b, qi, 0))

    scratch_shapes = [
        pltpu.VMEM((n_head, TL, dk), cd),           # cached Q (per q-tile)
        pltpu.VMEM((n_head, TL, 1), jnp.float32),   # running row max
        pltpu.VMEM((n_head, TL, 1), jnp.float32),   # running row sum
        pltpu.VMEM((n_head, TL, dk), jnp.float32),  # output accumulator
    ]

    # Resident-footprint estimate for the scoped VMEM limit.
    nbytes = 2 * sum(p.size * p.dtype.itemsize for p in main_params)           # weights (2-buf)
    nbytes += 2 * (2 * TL * D * x.dtype.itemsize + 2 * TKV * D * cd_sz)         # x/out + k/v tiles
    nbytes += n_head * TL * (2 * dk * 4 + dk * cd_sz + 2 * 128 * 4)             # scratch (lane-padded)
    nbytes += 4 * (2 * n_head * TL * TKV + TL * 4 * D + 3 * TL * D)             # s/p + MLP interm.
    vmem = _clamp_vmem(int(nbytes * 1.5))

    kernel = partial(flash_block_kernel, n_head=n_head, approx_recip=approx_recip)
    out_shape = jax.ShapeDtypeStruct((B, L, D), x.dtype)
    cparams = pltpu.CompilerParams(
        dimension_semantics=("parallel", "parallel", "arbitrary"),
        vmem_limit_bytes=vmem)

    def _call(buffer_count):
        return pl.pallas_call(
            kernel,
            out_shape=out_shape,
            grid_spec=pltpu.PrefetchScalarGridSpec(
                num_scalar_prefetch=0,
                grid=(B, n_q, n_kv),
                in_specs=[x_spec, k_spec, v_spec]
                         + _const_specs(main_params, 3, buffer_count=buffer_count),
                out_specs=out_spec,
                scratch_shapes=scratch_shapes),
            compiler_params=cparams,
        )(x, k, v, *main_params)

    try:
        # Weight blocks never change across the grid -> single-buffer them (saves VMEM).
        return _call(1)
    except Exception:
        # Fallback if this Pallas/Mosaic build does not accept pipeline_mode=Buffered(1).
        return _call(None)


# ---------------------------------------------------------------------------
# Parameter init + pure-JAX reference (for validation)
# ---------------------------------------------------------------------------
def init_params(key, d_model, n_head):
    dk = d_model // n_head
    ks = jax.random.split(key, 8)
    std_qk = math.sqrt(2.0 / (d_model + dk))
    # All Linear weights stored as (in, out): kernels do x @ W + b.
    return {
        "ln1_w": jnp.ones((1, d_model), jnp.float32),
        "ln1_b": jnp.zeros((1, d_model), jnp.float32),
        "wq": std_qk * jax.random.normal(ks[0], (d_model, n_head * dk), jnp.float32),
        "bq": jnp.zeros((1, n_head * dk), jnp.float32),
        "wk": std_qk * jax.random.normal(ks[1], (d_model, n_head * dk), jnp.float32),
        "bk": jnp.zeros((1, n_head * dk), jnp.float32),
        "wv": std_qk * jax.random.normal(ks[2], (d_model, n_head * dk), jnp.float32),
        "bv": jnp.zeros((1, n_head * dk), jnp.float32),
        "fc_w": math.sqrt(2.0 / (2 * d_model))
                * jax.random.normal(ks[3], (n_head * dk, d_model), jnp.float32),
        "fc_b": jnp.zeros((1, d_model), jnp.float32),
        "ln2_w": jnp.ones((1, d_model), jnp.float32),
        "ln2_b": jnp.zeros((1, d_model), jnp.float32),
        "w1": 0.02 * jax.random.normal(ks[4], (d_model, 4 * d_model), jnp.float32),
        "b1": 0.01 * jax.random.normal(ks[5], (1, 4 * d_model), jnp.float32),
        "w2": 0.02 * jax.random.normal(ks[6], (4 * d_model, d_model), jnp.float32),
        "b2": 0.01 * jax.random.normal(ks[7], (1, d_model), jnp.float32),
    }


def block_reference(x, p, n_head):
    B, L, D = x.shape
    dk = D // n_head

    def ln(v, w, b):
        mu = jnp.mean(v, -1, keepdims=True)
        var = jnp.mean((v - mu) ** 2, -1, keepdims=True)
        return (v - mu) / jnp.sqrt(var + 1e-5) * w + b

    lnx = ln(x, p["ln1_w"][0], p["ln1_b"][0])
    q = lnx @ p["wq"] + p["bq"][0]
    k = lnx @ p["wk"] + p["bk"][0]
    v = lnx @ p["wv"] + p["bv"][0]
    q = q.reshape(B, L, n_head, dk).transpose(2, 0, 1, 3)
    k = k.reshape(B, L, n_head, dk).transpose(2, 0, 1, 3)
    v = v.reshape(B, L, n_head, dk).transpose(2, 0, 1, 3)
    attn = jnp.einsum("hblk,hbtk->hblt", q, k) / math.sqrt(dk)
    attn = jax.nn.softmax(attn, axis=-1)
    out = jnp.einsum("hblt,hbtv->hblv", attn, v)
    out = out.transpose(1, 2, 0, 3).reshape(B, L, D)
    out = out @ p["fc_w"] + p["fc_b"][0]
    x1 = x + out
    ln2x = ln(x1, p["ln2_w"][0], p["ln2_b"][0])
    h = jax.nn.gelu(ln2x @ p["w1"] + p["b1"][0], approximate=False)
    return x1 + (h @ p["w2"] + p["b2"][0])


if __name__ == "__main__":
    key = jax.random.PRNGKey(0)
    kx1, kp1, kx2, kp2 = jax.random.split(key, 4)

    # --- 1) small strict check: f32 MXU operands, exact reciprocal, single KV tile ---
    B, L, D, H = 2, 8, 32, 4
    x = jax.random.normal(kx1, (B, L, D), jnp.float32)
    params = init_params(kp1, D, H)
    out = block_forward(x, params, H, compute_dtype=jnp.float32, approx_recip=False)
    out = jax.block_until_ready(out)
    ref = block_reference(x, params, H)
    assert out.shape == (B, L, D)
    assert jnp.allclose(out, ref, atol=1e-4, rtol=1e-4), "f32 mismatch vs. JAX reference"

    # --- 2) perf-path check: bf16, approx reciprocal, q-tiling AND kv-tiling (flash loop) ---
    B2, L2, D2, H2 = 2, 256, 128, 2
    x2 = jax.random.normal(kx2, (B2, L2, D2), jnp.float32)
    params2 = init_params(kp2, D2, H2)
    out2 = block_forward(x2, params2, H2, compute_dtype=jnp.bfloat16,
                         seq_tile=128, kv_tile=128, approx_recip=True)
    out2 = jax.block_until_ready(out2)
    ref2 = block_reference(x2, params2, H2)
    assert out2.shape == (B2, L2, D2)
    rel = jnp.linalg.norm(out2 - ref2) / jnp.linalg.norm(ref2)
    assert float(rel) < 2e-2, f"bf16 relative error too large: {float(rel)}"

    print("KERNEL_OK")
</pallas_src>

<mosaic_0001>
module attributes {stable_mosaic.version = 11 : i64} {
  func.func @kv_proj_kernel(%arg0: i32, %arg1: i32, %arg2: memref<1x8x32xf32, #tpu.memory_space<vmem>>, %arg3: memref<1x32xf32, #tpu.memory_space<vmem>>, %arg4: memref<1x32xf32, #tpu.memory_space<vmem>>, %arg5: memref<32x64xf32, #tpu.memory_space<vmem>>, %arg6: memref<1x64xf32, #tpu.memory_space<vmem>>, %arg7: memref<1x8x32xf32, #tpu.memory_space<vmem>>, %arg8: memref<1x8x32xf32, #tpu.memory_space<vmem>>) attributes {dimension_semantics = [#tpu.dimension_semantics<parallel>, #tpu.dimension_semantics<parallel>], iteration_bounds = array<i64: 2, 1>, scalar_prefetch = 0 : i64, scratch_operands = 0 : i64, tpu.core_type = #tpu.core_type<tc>, window_params = [{transform_indices = @transform_0, window_bounds = array<i64: 1, 8, 32>}, {pipeline_mode = #tpu.pipeline_mode<synchronous>, transform_indices = @transform_1, window_bounds = array<i64: 1, 32>}, {pipeline_mode = #tpu.pipeline_mode<synchronous>, transform_indices = @transform_2, window_bounds = array<i64: 1, 32>}, {pipeline_mode = #tpu.pipeline_mode<synchronous>, transform_indices = @transform_3, window_bounds = array<i64: 32, 64>}, {pipeline_mode = #tpu.pipeline_mode<synchronous>, transform_indices = @transform_4, window_bounds = array<i64: 1, 64>}, {transform_indices = @transform_5, window_bounds = array<i64: 1, 8, 32>}, {transform_indices = @transform_6, window_bounds = array<i64: 1, 8, 32>}]} {
    %c0 = arith.constant 0 : index
    %c0_0 = arith.constant 0 : index
    %c0_1 = arith.constant 0 : index
    %0 = vector.load %arg2[%c0, %c0_0, %c0_1] : memref<1x8x32xf32, #tpu.memory_space<vmem>>, vector<1x8x32xf32>
    %1 = vector.shape_cast %0 : vector<1x8x32xf32> to vector<8x32xf32>
    %c0_2 = arith.constant 0 : index
    %c0_3 = arith.constant 0 : index
    %2 = vector.load %arg3[%c0_2, %c0_3] : memref<1x32xf32, #tpu.memory_space<vmem>>, vector<1x32xf32>
    %c0_4 = arith.constant 0 : index
    %c0_5 = arith.constant 0 : index
    %3 = vector.load %arg4[%c0_4, %c0_5] : memref<1x32xf32, #tpu.memory_space<vmem>>, vector<1x32xf32>
    %cst = arith.constant dense<0.000000e+00> : vector<8xf32>
    %4 = vector.multi_reduction <add>, %1, %cst [1] : vector<8x32xf32> to vector<8xf32>
    %5 = vector.shape_cast %4 : vector<8xf32> to vector<8x1xf32>
    %cst_6 = arith.constant 3.200000e+01 : f32
    %6 = vector.broadcast %cst_6 : f32 to vector<8x1xf32>
    %7 = arith.divf %5, %6 : vector<8x1xf32>
    %8 = vector.broadcast %7 : vector<8x1xf32> to vector<8x32xf32>
    %9 = arith.subf %1, %8 : vector<8x32xf32>
    %10 = arith.mulf %9, %9 : vector<8x32xf32>
    %cst_7 = arith.constant dense<0.000000e+00> : vector<8xf32>
    %11 = vector.multi_reduction <add>, %10, %cst_7 [1] : vector<8x32xf32> to vector<8xf32>
    %12 = vector.shape_cast %11 : vector<8xf32> to vector<8x1xf32>
    %cst_8 = arith.constant 3.200000e+01 : f32
    %13 = vector.broadcast %cst_8 : f32 to vector<8x1xf32>
    %14 = arith.divf %12, %13 : vector<8x1xf32>
    %15 = vector.broadcast %7 : vector<8x1xf32> to vector<8x32xf32>
    %16 = arith.subf %1, %15 : vector<8x32xf32>
    %cst_9 = arith.constant 9.99999974E-6 : f32
    %17 = vector.broadcast %cst_9 : f32 to vector<8x1xf32>
    %18 = arith.addf %14, %17 : vector<8x1xf32>
    %19 = math.rsqrt %18 : vector<8x1xf32>
    %20 = vector.broadcast %19 : vector<8x1xf32> to vector<8x32xf32>
    %21 = arith.mulf %16, %20 : vector<8x32xf32>
    %22 = vector.broadcast %2 : vector<1x32xf32> to vector<8x32xf32>
    %23 = arith.mulf %21, %22 : vector<8x32xf32>
    %24 = vector.broadcast %3 : vector<1x32xf32> to vector<8x32xf32>
    %25 = arith.addf %23, %24 : vector<8x32xf32>
    %c0_10 = arith.constant 0 : index
    %c0_11 = arith.constant 0 : index
    %26 = vector.load %arg5[%c0_10, %c0_11] : memref<32x64xf32, #tpu.memory_space<vmem>>, vector<32x64xf32>
    %cst_12 = arith.constant dense<0.000000e+00> : vector<8x64xf32>
    %27 = tpu.matmul %25, %26, %cst_12 {dimension_numbers = #tpu.dot_dimension_numbers<[1], [0], [0], [1], [0, 0, 1, 1], [], []>} : vector<8x32xf32>, vector<32x64xf32>, vector<8x64xf32> -> vector<8x64xf32>
    %c0_13 = arith.constant 0 : index
    %c0_14 = arith.constant 0 : index
    %28 = vector.load %arg6[%c0_13, %c0_14] : memref<1x64xf32, #tpu.memory_space<vmem>>, vector<1x64xf32>
    %29 = vector.broadcast %28 : vector<1x64xf32> to vector<8x64xf32>
    %30 = arith.addf %27, %29 : vector<8x64xf32>
    %31 = vector.extract_strided_slice %30 {offsets = [0, 0], sizes = [8, 32], strides = [1, 1]} : vector<8x64xf32> to vector<8x32xf32>
    %c0_15 = arith.constant 0 : index
    %c0_16 = arith.constant 0 : index
    %c0_17 = arith.constant 0 : index
    %32 = vector.load %arg7[%c0_15, %c0_16, %c0_17] : memref<1x8x32xf32, #tpu.memory_space<vmem>>, vector<1x8x32xf32>
    %33 = vector.shape_cast %32 : vector<1x8x32xf32> to vector<8x32xf32>
    %34 = vector.shape_cast %31 : vector<8x32xf32> to vector<1x8x32xf32>
    tpu.vector_store %arg7[%c0_15, %c0_16, %c0_17], %34 {strides = array<i32>} : memref<1x8x32xf32, #tpu.memory_space<vmem>>, vector<1x8x32xf32>,
    %35 = vector.extract_strided_slice %30 {offsets = [0, 32], sizes = [8, 32], strides = [1, 1]} : vector<8x64xf32> to vector<8x32xf32>
    %c0_18 = arith.constant 0 : index
    %c0_19 = arith.constant 0 : index
    %c0_20 = arith.constant 0 : index
    %36 = vector.load %arg8[%c0_18, %c0_19, %c0_20] : memref<1x8x32xf32, #tpu.memory_space<vmem>>, vector<1x8x32xf32>
    %37 = vector.shape_cast %36 : vector<1x8x32xf32> to vector<8x32xf32>
    %38 = vector.shape_cast %35 : vector<8x32xf32> to vector<1x8x32xf32>
    tpu.vector_store %arg8[%c0_18, %c0_19, %c0_20], %38 {strides = array<i32>} : memref<1x8x32xf32, #tpu.memory_space<vmem>>, vector<1x8x32xf32>,
    return
  }
  func.func @transform_0(%arg0: i32, %arg1: i32) -> (i32, i32, i32) {
    %c0_i32 = arith.constant 0 : i32
    %c0_i32_0 = arith.constant 0 : i32
    return %arg0, %arg1, %c0_i32 : i32, i32, i32
  }
  func.func @transform_1(%arg0: i32, %arg1: i32) -> (i32, i32) {
    %c0_i32 = arith.constant 0 : i32
    %c0_i32_0 = arith.constant 0 : i32
    %c0_i32_1 = arith.constant 0 : i32
    return %c0_i32, %c0_i32_0 : i32, i32
  }
  func.func @transform_2(%arg0: i32, %arg1: i32) -> (i32, i32) {
    %c0_i32 = arith.constant 0 : i32
    %c0_i32_0 = arith.constant 0 : i32
    %c0_i32_1 = arith.constant 0 : i32
    return %c0_i32, %c0_i32_0 : i32, i32
  }
  func.func @transform_3(%arg0: i32, %arg1: i32) -> (i32, i32) {
    %c0_i32 = arith.constant 0 : i32
    %c0_i32_0 = arith.constant 0 : i32
    %c0_i32_1 = arith.constant 0 : i32
    return %c0_i32, %c0_i32_0 : i32, i32
  }
  func.func @transform_4(%arg0: i32, %arg1: i32) -> (i32, i32) {
    %c0_i32 = arith.constant 0 : i32
    %c0_i32_0 = arith.constant 0 : i32
    %c0_i32_1 = arith.constant 0 : i32
    return %c0_i32, %c0_i32_0 : i32, i32
  }
  func.func @transform_5(%arg0: i32, %arg1: i32) -> (i32, i32, i32) {
    %c0_i32 = arith.constant 0 : i32
    %c0_i32_0 = arith.constant 0 : i32
    return %arg0, %arg1, %c0_i32 : i32, i32, i32
  }
  func.func @transform_6(%arg0: i32, %arg1: i32) -> (i32, i32, i32) {
    %c0_i32 = arith.constant 0 : i32
    %c0_i32_0 = arith.constant 0 : i32
    return %arg0, %arg1, %c0_i32 : i32, i32, i32
  }
}

</mosaic_0001>

<bundles_post_ra>
// kernel: tpu_custom_call.1
= control target key start
LH: loop header
LB: loop body
LE: loop exit
PB: predicated region body
PF: predicated region fallthrough
CT: control target
= control target key end

     0   :  { %s1152_s0 = inlined_call_operand.hbm [shape: f32[2,8,32], index: 0, kind: input, shape index: {}]   ;;  %s1153_s1 = inlined_call_operand.vmem [shape: f32[1,32], index: 1, kind: input, shape index: {}]   ;;  %s1154_s2 = inlined_call_operand.vmem [shape: f32[1,32], index: 2, kind: input, shape index: {}]   ;;  %s1155_s3 = inlined_call_operand.hbm [shape: f32[32,64], index: 3, kind: input, shape index: {}]   ;;  %s1156_s4 = inlined_call_operand.vmem [shape: f32[1,64], index: 4, kind: input, shape index: {}]   ;;  %s1157_s5 = inlined_call_operand.hbm [shape: f32[2,8,32], index: 5, kind: output, shape index: {0}]   ;;  %s1158_s6 = inlined_call_operand.hbm [shape: f32[2,8,32], index: 6, kind: output, shape index: {1}]  }
   0x1   :  { %1162 = sst [smem:[#allocation16_spill]] %s1155_s3 }
   0x2   :  { %12 = vsyncpa [#allocation3], 0 }
   0x3   :  { %14 = vsyncpa [#allocation3 + $0x1], 0 }
   0x4   :  { %15 = vsyncpa [#allocation6], 0 }
   0x5   :  { %16 = vsyncpa [#allocation4], 0 }
   0x6   :  { %18 = vsyncpa [#allocation4 + $0x1], 0 }
   0x7   :  { %19 = vsyncpa [#allocation9], 0 }
   0x8   :  { %21 = vsyncpa [#allocation9 + $0x1], 0  ;;  %s928_s21 = smov 0   ;;  %s930_s22 = smov 0  }
   0x9   :  { %s932_s23 = smov 0   ;;  %s934_s24 = smov 0  }
   0xa   :  { %s936_s25 = smov 0   ;;  %s938_s26 = smov 0  }
   0xb LB: > { %1163 = sst [smem:[#allocation14_spill]] %s878_s25  ;;  %s591_s27 = sadd.s32 4294967295, %s882_s26   ;;  %s882_s26 = sphi %s938_s26, %s27_s26   ;;  %s878_s25 = sphi %s936_s25, %s1179_s25   ;;  %s874_s24 = sphi %s934_s24, %s1178_s24   ;;  %s870_s23 = sphi %s932_s23, %s1182_s23   ;;  %s866_s22 = sphi %s930_s22, %s1181_s22   ;;  %s862_s21 = sphi %s928_s21, %s1180_s21  }
   0xc   : > { %s592_s28 = sadd.s32 4294967294, %s882_s26   ;;  %p61_p0 = scmp.ne.s32.totalorder %s866_s22, %s862_s21 }
   0xd   : > { %p962_p1 = scmp.eq.s32.totalorder %s591_s27, 0  ;;  %p966_p2 = scmp.eq.s32.totalorder %s591_s27, 1 }
   0xe   : > { %p177_p3 = scmp.eq.s32.totalorder %s592_s28, 1  ;;  %p593_p5 = scmp.ge.s32.totalorder %s882_s26, 1 }
   0xf   : > { %p972_p4 = por %p962_p1, %p61_p0  ;;  %p212_p7 = scmp.lt.s32.totalorder %s882_s26, 3 }
  0x10   : > { %p977_p6 = por %p177_p3, %p61_p0  ;;  %s884_s10 = smov [#allocation5]  }
  0x11   : > { %s1166_s7 = scalar_select %p972_p4, 1, 0 }
  0x12   : > { %s1167_s8 = scalar_select %p977_p6, 1, 0 }
  0x13   : > { %p982_p8 = pnand %p593_p5, %p212_p7  ;;  %s230_s11 = sshll.u32 %s884_s10, 4  ;;  %s231_s11 = int_to_ptr.vmem [resolvable:$true] %s230_s11 }
  0x14   : > { %s39_s13 = sadd.s32 1, %s878_s25  ;;  %s725_s14 = scalar_lea.vmem %s231_s11, 512 }
  0x15   : > { %p639_p9 = pneg %p982_p8  ;;  %p726_p13 = scmp.ne.s32.totalorder %s231_s11, %s725_s14 }
  0x16   : > { %p733_p5 = scmp.lt.s32.totalorder %s231_s11, %s231_s11  ;;  %p734_p7 = scmp.lt.s32.totalorder %s725_s14, %s725_s14 }
  0x17   : > { %p991_p11 = pnand %p639_p9, %p962_p1 }
  0x18   : > { %p735_p6 = por %p734_p7, %p733_p5 }
  0x19   : > { %p716_p12 = pneg %p991_p11 }
  0x1b   : > { %p728_p0 = pnand %p726_p13, %p716_p12 }
  0x1d   : > { %p729_p3 = pneg %p728_p0 }
  0x1f   : > { %p736_p4 = pnand %p735_p6, %p729_p3 }
  0x21   : > { %739 = shalt.err (!%p736_p4)
}
  0x22   : > { %s885_s15 = smov 128   ;;  %s886_s16 = smov 8  }
  0x23   : > { %s1170_s3 = sld [smem:[#allocation16_spill]]  ;;  %p41_p6 = scmp.ge.s32.totalorder %s39_s13, 2 }
  0x24   : > { %s48_s19 = sadd.s32 1, %s870_s23  ;;  %p55_p4 = scmp.ne.s32.totalorder %s870_s23, %s866_s22 }
  0x25   : > { %p56_p9 = scmp.eq.s32.totalorder %s882_s26, 0  ;;  %s1184_s13 = smov (%p41_p6, %s39_s13), 0 }
  0x26   : > { %1171 = sst [smem:[#allocation15_spill]] %s1184_s13  ;;  %p1015_p13 = por %p966_p2, %p55_p4 }
  0x27   : > { %p1009_p12 = por %p56_p9, %p55_p4  ;;  %s43_s28 = ssub.s32 %s878_s25, %s1184_s13 }
  0x28   : > { %p655_p0 = scmp.lt.s32.totalorder %s882_s26, 2  ;;  %s247_s10 = sand.u32 1, %s870_s23  }
  0x29   : > { %642 = dma.hbm_to_vmem [thread:$0]  (!%p991_p11), %s1170_s3, 512, %s231_s11, [#allocation6], %s885_s15, %s885_s15, %s886_s16  }
  0x2a   : > { %p46_p11 = scmp.eq.s32.totalorder %s43_s28, 0  ;;  %s596_s11 = sshll.u32 %s247_s10, 3 }
  0x2b   : > { %s597_s14 = sshll.u32 %s878_s25, 7  ;;  %s251_s18 = scalar_lea.vmem [#allocation2], %s596_s11 }
  0x2c   : > { %s1024_s12 = scalar_select %p46_p11, %s870_s23, %s48_s19  }
  0x2d   : > { %s257_s17 = scalar_lea.hbm %s1152_s0, %s597_s14  ;;  %s259_s3 = sshll.u32 %s251_s18, 4  ;;  %s260_s3 = int_to_ptr.vmem [resolvable:$true] %s259_s3 }
  0x2e   : > { %p1032_p2 = pnand %p655_p0, %p1009_p12  ;;  %s248_s13 = scalar_lea.sflag [#allocation3], %s247_s10 }
  0x2f   : > { %s753_s28 = scalar_lea.vmem %s260_s3, 128  ;;  %s887_s19 = smov [#allocation2]  }
  0x30   : > { %p742_p3 = pneg %p1032_p2  ;;  %p754_p5 = scmp.ne.s32.totalorder %s260_s3, %s753_s28 }
  0x31   : > { %s758_s25 = sshll.u32 %s887_s19, 4  ;;  %s759_s25 = int_to_ptr.vmem [resolvable:$false] %s758_s25 }
  0x32   : > { %p756_p7 = pnand %p754_p5, %p742_p3  ;;  %s760_s14 = scalar_lea.vmem %s759_s25, 256 }
  0x33   : > { %p761_p4 = scmp.lt.s32.totalorder %s260_s3, %s759_s25  ;;  %p762_p9 = scmp.lt.s32.totalorder %s760_s14, %s753_s28 }
  0x34   : > { %p757_p6 = pneg %p756_p7 }
  0x35   : > { %p763_p11 = por %p762_p9, %p761_p4 }
  0x37   : > { %p764_p10 = pnand %p763_p11, %p757_p6 }
  0x39   : > { %767 = shalt.err (!%p764_p10)
}
  0x3a   : > { %646 = dma.hbm_to_vmem [thread:$0]  (!%p1032_p2), %s257_s17, 128, %s260_s3, %s248_s13  }
  0x3b   : > { %268 = sbr.rel (%p982_p8) target bundleno = 699 (0x2bb), region = 40  ;;  %s1043_s20 = sand.u32 (!%p982_p8), 1, %s866_s22  }
  0x3c   : > { %s1046_s10 = sshll.u32 (!%p982_p8), %s1043_s20, 3  ;;  %s271_s25 = scalar_lea.sflag (!%p982_p8), [#allocation3], %s1043_s20 }
  0x3d   : > { %s274_s11 = scalar_lea.vmem (!%p982_p8), [#allocation2], %s1046_s10  ;;  %p1175_p12 = scmp.ne.s32.totalorder (!%p982_p8), %s1166_s7, 0 }
  0x40   : > { %845 = dma.done.wait (%p1175_p12), %s271_s25, 128  }
  0x41   : > { %847 = vsyncadd (%p1175_p12), %s271_s25, 4294967168 }
  0x42   : > { %849 = dma.done.wait (%p962_p1), [#allocation6], 512  }
  0x43   : > { %851 = vsyncadd (%p962_p1), [#allocation6], 4294966784  ;;  %vm315_vm0 = vcmask 261120   ;;  %v312_v0 = vld [vmem:[%s274_s11] sm:$0xff]  ;;  %v888_v8 = vmov 0.0   ;;  %vm889_vm1 = vmmov 0  }
  0x44   : > { %v316_v1 = vsel %vm315_vm0, %v312_v0, 0.0  ;;  %v347_v7 = vld [vmem:[#allocation5 + $0x18] sm:$0xff]  ;;  %618 = vmatprep.subr.mxu0 %v888_v8  ;;  %v346_v9 = vld [vmem:[#allocation5 + $0x10] sm:$0xff]  ;;  %626 = vmatprep.mubr.msk.f32.mxu0 %vm889_vm1, %v888_v8  ;;  %v345_v10 = vld [vmem:[#allocation5 + $0x8] sm:$0xff]  ;;  %s609_s16 = sshll.u32 %s874_s24, 7  ;;  %s304_s17 = scalar_lea.vmem [#allocation7], %s1046_s10 }
  0x45   : > { %317 = vadd.xlane.f32.xlu0 %v316_v1  ;;  %619 = vmatpush3.msra.mxu0 %v347_v7  ;;  %v344_v11 = vld [vmem:[#allocation5] sm:$0xff]  ;;  %v603_v16 = vld [vmem:[%s1153_s1] ss:$0 sm:$0xff]  ;;  %s454_s18 = sshll.u32 %s304_s17, 4  ;;  %s1077_s19 = scalar_lea.hbm %s1157_s5, %s609_s16  ;;  %s1079_s18 = int_to_ptr.vmem [resolvable:$true] %s454_s18 }
  0x46   : > { %620 = vmatprep.subr.mxu0 %v888_v8  ;;  %v604_v18 = vld [vmem:[%s1154_s2] ss:$0 sm:$0xff]  ;;  %s890_s14 = smov 96   ;;  %s435_s25 = scalar_lea.sflag [#allocation4], %s1043_s20 }
  0x47   : > { %621 = vmatpush3.msra.mxu0 %v346_v9  ;;  %v605_v21 = vld [vmem:[%s1156_s4] ss:$0 sm:$0xff]  ;;  %s768_s11 = scalar_lea.vmem %s1079_s18, 128  ;;  %s891_s3 = smov [#allocation7]  }
  0x48   : > { %622 = vmatprep.subr.mxu0 %v888_v8  ;;  %p769_p1 = scmp.ne.s32.totalorder %s1079_s18, %s768_s11  ;;  %s772_s29 = sshll.u32 %s891_s3, 4  ;;  %s773_s29 = int_to_ptr.vmem [resolvable:$false] %s772_s29 }
  0x49   : > { %623 = vmatpush3.msra.mxu0 %v345_v10  ;;  %s774_s7 = scalar_lea.vmem %s773_s29, 256  ;;  %p775_p0 = scmp.lt.s32.totalorder %s1079_s18, %s773_s29 }
  0x4a   : > { %624 = vmatprep.subr.mxu0 %v888_v8  ;;  %p770_p8 = pnand %p769_p1, %p1015_p13  ;;  %p776_p2 = scmp.lt.s32.totalorder %s774_s7, %s768_s11 }
  0x4b   : > { %625 = vmatpush3.msra.mxu0 %v344_v11 }
  0x4c   : > { %p771_p10 = pneg %p770_p8  ;;  %p777_p3 = por %p776_p2, %p775_p0 }
  0x4e   : > { %p778_p5 = pnand %p777_p3, %p771_p10 }
  0xce   : > { %v318_v2 = vpop.xlane.xlu0 %317 }
  0xcf   : > { %v320_v3 = vmul.f32 0.03125, %v318_v2 }
  0xd1   : > { %v321_v4 = vsub.f32 %v312_v0, %v320_v3 }
  0xd3   : > { %v322_v5 = vmul.f32 %v321_v4, %v321_v4 }
  0xd5   : > { %v323_v6 = vsel %vm315_vm0, %v322_v5, 0.0 }
  0xd6   : > { %324 = vadd.xlane.f32.xlu0 %v323_v6 }
 0x15f   : > { %v325_v12 = vpop.xlane.xlu0 %324 }
 0x160   : > { %v326_v13 = vmul.f32 0.03125, %v325_v12 }
 0x162   : > { %v327_v14 = vadd.f32 1e-05, %v326_v13 }
 0x164   : > { %712 = vrsqrt.f32 %v327_v14 }
 0x171   : > { %v713_v15 = vpop.eup %712 }
 0x172   : > { %v329_v17 = vmul.f32 %v713_v15, %v321_v4 }
 0x174   : > { %v336_v19 = vmul.f32 %v603_v16, %v329_v17 }
 0x176   : > { %v343_v20 = vadd.f32 %v604_v18, %v336_v19 }
 0x178   : > { %627 = vmatmul.mubr.msk.f32.vlgmr.msra.gmra.mxu0 %vm315_vm0, %v343_v20 }
 0x238   : > { %v424_v22 = vpop.f32.mrf.mxu0 }
 0x239   : > { %v425_v23 = vadd.f32 %v605_v21, %v424_v22 }
 0x23a   : > { %v628_v24 = vpop.f32.mrf.mxu0 }
 0x23b   : > { %430 = vrot.lane.b32.xlu1 %v425_v23, %s890_s14  ;;  %428 = vst.msk [vmem:[%s304_s17] sm:$0xff] %vm315_vm0, %v425_v23 }
 0x23c   : > { %781 = shalt.err (!%p778_p5)
}
 0x23d   : > { %s782_s9 = scalar_lea.hbm %s1077_s19, 128  ;;  %s786_s17 = scalar_lea.hbm %s1157_s5, 256 }
 0x23e   : > { %p783_p7 = scmp.ne.s32.totalorder %s1077_s19, %s782_s9  ;;  %p787_p9 = scmp.lt.s32.totalorder %s1077_s19, %s1157_s5 }
 0x23f   : > { %p788_p11 = scmp.lt.s32.totalorder %s786_s17, %s782_s9 }
 0x240   : > { %p784_p6 = pnand %p783_p7, %p1015_p13 }
 0x241   : > { %p789_p12 = por %p788_p11, %p787_p9 }
 0x242   : > { %p785_p4 = pneg %p784_p6 }
 0x244   : > { %p790_p1 = pnand %p789_p12, %p785_p4 }
 0x246   : > { %793 = shalt.err (!%p790_p1)
}
 0x247   : > { %635 = dma.vmem_to_hbm [thread:$0]  (%p1015_p13), %s1079_s18, 128, %s1077_s19, %s435_s25  }
 0x248   : > { %s311_s14 = scalar_lea.vmem [#allocation8], %s1046_s10  ;;  %s1109_s7 = scalar_lea.hbm %s1158_s6, %s609_s16 }
 0x249   : > { %s468_s11 = sshll.u32 %s311_s14, 4  ;;  %s440_s9 = scalar_lea.sflag [#allocation9], %s1043_s20  ;;  %s469_s11 = int_to_ptr.vmem [resolvable:$true] %s468_s11 }
 0x24a   : > { %s794_s13 = scalar_lea.vmem %s469_s11, 128  ;;  %s892_s15 = smov [#allocation8]  }
 0x24b   : > { %p795_p8 = scmp.ne.s32.totalorder %s469_s11, %s794_s13  ;;  %s798_s18 = sshll.u32 %s892_s15, 4  ;;  %s799_s18 = int_to_ptr.vmem [resolvable:$false] %s798_s18 }
 0x24c   : > { %s800_s10 = scalar_lea.vmem %s799_s18, 256  ;;  %p801_p2 = scmp.lt.s32.totalorder %s469_s11, %s799_s18 }
 0x24d   : > { %p796_p10 = pnand %p795_p8, %p1015_p13  ;;  %p802_p3 = scmp.lt.s32.totalorder %s800_s10, %s794_s13 }
 0x24f   : > { %p797_p0 = pneg %p796_p10  ;;  %p803_p5 = por %p802_p3, %p801_p2 }
 0x251   : > { %p804_p7 = pnand %p803_p5, %p797_p0 }
 0x2ad   : > { %v431_v25 = vpop.permute.xlu1 %430 }
 0x2ae   : > { %433 = vst.msk [vmem:[%s311_s14] sm:$0xff] %vm315_vm0, %v431_v25 }
 0x2af   : > { %807 = shalt.err (!%p804_p7)
}
 0x2b0   : > { %s808_s24 = scalar_lea.hbm %s1109_s7, 128  ;;  %s812_s19 = scalar_lea.hbm %s1158_s6, 256 }
 0x2b1   : > { %p809_p6 = scmp.ne.s32.totalorder %s1109_s7, %s808_s24  ;;  %p813_p11 = scmp.lt.s32.totalorder %s1109_s7, %s1158_s6 }
 0x2b2   : > { %p814_p12 = scmp.lt.s32.totalorder %s812_s19, %s808_s24 }
 0x2b3   : > { %p810_p4 = pnand %p809_p6, %p1015_p13 }
 0x2b4   : > { %p815_p1 = por %p814_p12, %p813_p11 }
 0x2b5   : > { %p811_p9 = pneg %p810_p4 }
 0x2b7   : > { %p816_p8 = pnand %p815_p1, %p811_p9 }
 0x2b9   : > { %819 = shalt.err (!%p816_p8)
}
 0x2ba   : > { %636 = dma.vmem_to_hbm [thread:$0]  (%p1015_p13), %s469_s11, 128, %s1109_s7, %s440_s9  }
 0x2bb PF: > { %s480_s30 = sand.u32 1, %s862_s21   ;;  %p1176_p10 = scmp.ne.s32.totalorder %s1167_s8, 0 }
 0x2bc   : > { %p1177_p0 = scmp.ge.s32.totalorder %s882_s26, 2  ;;  %s481_s28 = scalar_lea.sflag [#allocation4], %s480_s30 }
 0x2be   : > { %p648_p2 = pnand %p1177_p0, %p1176_p10 }
 0x2c0   : > { %p649_p3 = pneg %p648_p2 }
 0x2c2   : > { %853 = dma.done.wait (%p649_p3), %s481_s28, 128  }
 0x2c3   : > { %855 = vsyncadd (%p649_p3), %s481_s28, 4294967168  ;;  %s490_s14 = scalar_lea.sflag [#allocation9], %s480_s30 }
 0x2c4   : > { %857 = dma.done.wait (%p649_p3), %s490_s14, 128  }
 0x2c5   : > { %859 = vsyncadd (%p649_p3), %s490_s14, 4294967168  ;;  %s27_s26 = sadd.s32 1, %s882_s26   ;;  %s1178_s24 = sld [smem:[#allocation14_spill]] }
 0x2c6   : > { %p24_p5 = scmp.ge.s32.totalorder %s27_s26, 4   ;;  %s1179_s25 = sld [smem:[#allocation15_spill]] }
 0x2c7   : > { %s1180_s21 = smov %s866_s22  ;;  %s1181_s22 = smov %s870_s23 }
 0x2c8   : > { %s1182_s23 = smov %s1024_s12  ;;  %26 = sbr.rel (!%p24_p5) target bundleno = 11 (0xb), region = 106 }
 0x2cd   :  { %495 = vsyncpa [#allocation3], 1 }
 0x2ce   :  { %497 = vsyncpa [#allocation3 + $0x1], 1 }
 0x2cf   :  { %498 = vsyncpa [#allocation6], 1 }
 0x2d0   :  { %499 = vsyncpa [#allocation4], 1 }
 0x2d1   :  { %501 = vsyncpa [#allocation4 + $0x1], 1 }
 0x2d2   :  { %502 = vsyncpa [#allocation9], 1 }
 0x2d3   :  { %504 = vsyncpa [#allocation9 + $0x1], 1 }

</bundles_post_ra>
